<compile_context>
chip_gen: v7x
topology: tpu7x:2x2x1
jax: 0.10.0
libtpu: 0.0.40
codegen_flags: <defaults>
</compile_context>

<pallas_src>
import functools

import jax
import jax.numpy as jnp
from jax import lax
from jax.experimental import pallas as pl
from jax.experimental.pallas import tpu as pltpu


# ----------------------------- dynamic routing (Pallas) -----------------------

_SQUASH_EPS = 1e-9


def _routing_kernel(u_ref, v_ref, *, num_routes):
    """Dynamic routing on one lane-tile of u_hat.

    u_ref : (B, IC, OC, D, T)  f32   (T = lane tile, multiple of 128)
    v_ref : (B, OC, D, T)      f32
    All reductions run over non-lane axes (IC, D, batch); D is the sublane axis.
    """
    u = u_ref[...]                                           # (B, IC, OC, D, T)
    IC = u.shape[1]

    def squash(s):
        # s: (B, OC, D, T); reduce over D (sublane axis), keepdims => lane-dense
        sq = jnp.sum(s * s, axis=2, keepdims=True)           # (B, OC, 1, T)
        # s*sq/((1+sq)*sqrt(sq)) == s*sqrt(sq)/(1+sq); rsqrt/reciprocal -> EUP.
        scale = (sq * lax.rsqrt(sq + _SQUASH_EPS)) * pl.reciprocal(
            1.0 + sq, approx=True)
        return s * scale

    v = None
    b_ij = None                                              # (IC, OC, 1, T)
    for it in range(num_routes):
        if it == 0:
            # b_ij == 0 -> softmax over IC is uniform (1/IC): skip the exp pass.
            s = jnp.sum(u, axis=1) * (1.0 / IC)              # (B, OC, D, T)
        else:
            m = jnp.max(b_ij, axis=0, keepdims=True)         # (1, OC, 1, T)
            e = jnp.exp(b_ij - m)
            c = e * pl.reciprocal(jnp.sum(e, axis=0, keepdims=True), approx=True)
            s = jnp.sum(c[None] * u, axis=1)                 # (B, OC, D, T)
        v = squash(s)
        if it < num_routes - 1:
            # agreement <u, v> over D (sublane reduce), then mean over batch.
            a = jnp.sum(u * v[:, None], axis=3, keepdims=True)  # (B, IC, OC, 1, T)
            upd = jnp.mean(a, axis=0)                        # (IC, OC, 1, T)
            b_ij = upd if b_ij is None else b_ij + upd
    v_ref[...] = v


def _round_up(x, m):
    return ((x + m - 1) // m) * m


def dynamic_routing(u5, *, num_routes):
    """u5: (B, IC, OC, D, PQ) f32  ->  v: (B, OC, D, PQ) f32."""
    B, IC, OC, D, PQ = u5.shape
    pq_pad = _round_up(PQ, 128)
    if pq_pad != PQ:
        # zero-padded lane columns squash to v == 0 (eps) and are sliced off below
        u5 = jnp.pad(u5, ((0, 0),) * 4 + ((0, pq_pad - PQ),))

    # Pick the largest aligned lane tile whose (double-buffered in + out) block
    # stays well inside scoped VMEM on all generations (v7x has only 64 MiB).
    bytes_per_lane = (B * IC * OC * D + B * OC * D) * 4
    tpq = 128
    for cand in (512, 256):
        if pq_pad % cand == 0 and 3 * bytes_per_lane * cand <= 8 * 1024 * 1024:
            tpq = cand
            break

    kern = functools.partial(_routing_kernel, num_routes=num_routes)
    v = pl.pallas_call(
        kern,
        out_shape=jax.ShapeDtypeStruct((B, OC, D, pq_pad), jnp.float32),
        grid=(pq_pad // tpq,),
        in_specs=[pl.BlockSpec((B, IC, OC, D, tpq), lambda i: (0, 0, 0, 0, i))],
        out_specs=pl.BlockSpec((B, OC, D, tpq), lambda i: (0, 0, 0, i)),
        compiler_params=pltpu.CompilerParams(
            dimension_semantics=("parallel",),
            vmem_limit_bytes=32 * 1024 * 1024),
    )(u5)
    return v[..., :PQ]


# ----------------------------- full forward ----------------------------------


def conv_capsule_forward(x, weight, bias, *, in_capsules, out_capsules,
                         in_channels, out_channels, kernel=4, stride=2,
                         padding=2, num_routes=3):
    """x: (B, in_caps, in_channels, H, W) -> (B, out_caps, out_channels, OH, OW)."""
    B = x.shape[0]
    x_flat = x.reshape(B * in_capsules, in_channels, x.shape[3], x.shape[4])
    # Conv2d: bf16 MXU inputs, f32 accumulation (native fast path on v6e/v7x,
    # halves the HBM read of x and weight).  No im2col materialization.
    u = lax.conv_general_dilated(
        x_flat.astype(jnp.bfloat16), weight.astype(jnp.bfloat16),
        window_strides=(stride, stride),
        padding=((padding, padding), (padding, padding)),
        dimension_numbers=("NCHW", "OIHW", "NCHW"),
        preferred_element_type=jnp.float32)
    u = u + bias.astype(jnp.float32)[None, :, None, None]   # fused conv epilogue
    oh, ow = u.shape[2], u.shape[3]
    # NCHW conv output -> routing layout (B, IC, OC, D, OH*OW): pure reshape,
    # no transpose (conv channel index is oc*D + d, exactly as PyTorch views it).
    u5 = u.reshape(B, in_capsules, out_capsules, out_channels, oh * ow)
    v = dynamic_routing(u5, num_routes=num_routes)           # (B, OC, D, OH*OW)
    return v.reshape(B, out_capsules, out_channels, oh, ow)


# ----------------------------- pure-JAX reference -----------------------------


def reference_forward(x, weight, bias, *, in_capsules, out_capsules, in_channels,
                      out_channels, kernel=4, stride=2, padding=2, num_routes=3):
    """Faithful f32 mirror of the PyTorch module (NHWC permutes, no eps)."""
    B = x.shape[0]
    xf = x.reshape(B * in_capsules, in_channels, x.shape[3], x.shape[4])
    u = lax.conv_general_dilated(
        xf, weight, window_strides=(stride, stride),
        padding=((padding, padding), (padding, padding)),
        dimension_numbers=("NCHW", "OIHW", "NCHW"),
        precision=lax.Precision.HIGHEST) + bias[None, :, None, None]
    oh, ow = u.shape[2], u.shape[3]
    u = jnp.transpose(u, (0, 2, 3, 1)).reshape(
        B, in_capsules, oh, ow, out_capsules, out_channels)
    b_ij = jnp.zeros((1, in_capsules, oh, ow, out_capsules), jnp.float32)
    v = None
    for it in range(num_routes):
        c = jax.nn.softmax(b_ij, axis=1)[..., None]
        s = jnp.sum(c * u, axis=1, keepdims=True)
        sq = jnp.sum(s * s, axis=-1, keepdims=True)
        v = (s * sq / ((1.0 + sq) * jnp.sqrt(sq)))[:, 0]
        if it < num_routes - 1:
            a = jnp.sum(u * v[:, None], axis=-1)
            b_ij = b_ij + jnp.mean(a, axis=0, keepdims=True)
    return jnp.transpose(v, (0, 3, 4, 1, 2))


# ----------------------------- demo -------------------------------------------


if __name__ == "__main__":
    B, IC, CIN, H, W = 2, 2, 4, 16, 16
    OC, D = 4, 8
    K, STRIDE, PAD, ROUTES = 4, 2, 2, 3

    key = jax.random.PRNGKey(0)
    kx, kw, kb = jax.random.split(key, 3)
    x = jax.random.normal(kx, (B, IC, CIN, H, W), jnp.float32)

    fan_in = CIN * K * K
    bound = 1.0 / (fan_in ** 0.5)
    weight = jax.random.uniform(kw, (OC * D, CIN, K, K), jnp.float32, -bound, bound)
    bias = jax.random.uniform(kb, (OC * D,), jnp.float32, -bound, bound)

    fwd = jax.jit(functools.partial(
        conv_capsule_forward, in_capsules=IC, out_capsules=OC, in_channels=CIN,
        out_channels=D, kernel=K, stride=STRIDE, padding=PAD, num_routes=ROUTES))
    out = jax.block_until_ready(fwd(x, weight, bias))

    oh = (H + 2 * PAD - K) // STRIDE + 1
    ow = (W + 2 * PAD - K) // STRIDE + 1
    assert out.shape == (B, OC, D, oh, ow), out.shape

    ref = reference_forward(
        x, weight, bias, in_capsules=IC, out_capsules=OC, in_channels=CIN,
        out_channels=D, kernel=K, stride=STRIDE, padding=PAD, num_routes=ROUTES)
    # Tolerance widened vs. the previous (all-f32) version because the conv now
    # uses bf16 MXU inputs (per perf review) while the reference is f32/HIGHEST.
    max_err = float(jnp.max(jnp.abs(out - ref)))
    assert jnp.allclose(out, ref, rtol=2e-2, atol=2e-2), max_err

    print("KERNEL_OK")
</pallas_src>

<mosaic_0001>
module attributes {stable_mosaic.version = 11 : i64} {
  func.func @_routing_kernel(%arg0: i32, %arg1: memref<2x2x4x8x128xf32, #tpu.memory_space<vmem>>, %arg2: memref<2x4x8x128xf32, #tpu.memory_space<vmem>>) attributes {dimension_semantics = [#tpu.dimension_semantics<parallel>], iteration_bounds = array<i64: 1>, scalar_prefetch = 0 : i64, scratch_operands = 0 : i64, tpu.core_type = #tpu.core_type<tc>, window_params = [{transform_indices = @transform_0, window_bounds = array<i64: 2, 2, 4, 8, 128>}, {transform_indices = @transform_1, window_bounds = array<i64: 2, 4, 8, 128>}]} {
    %c0 = arith.constant 0 : index
    %c0_0 = arith.constant 0 : index
    %c0_1 = arith.constant 0 : index
    %c0_2 = arith.constant 0 : index
    %c0_3 = arith.constant 0 : index
    %0 = vector.load %arg1[%c0, %c0_0, %c0_1, %c0_2, %c0_3] : memref<2x2x4x8x128xf32, #tpu.memory_space<vmem>>, vector<2x2x4x8x128xf32>
    %cst = arith.constant dense<0.000000e+00> : vector<2x4x8x128xf32>
    %1 = vector.multi_reduction <add>, %0, %cst [1] : vector<2x2x4x8x128xf32> to vector<2x4x8x128xf32>
    %cst_4 = arith.constant 5.000000e-01 : f32
    %2 = vector.broadcast %cst_4 : f32 to vector<2x4x8x128xf32>
    %3 = arith.mulf %1, %2 : vector<2x4x8x128xf32>
    %4 = arith.mulf %3, %3 : vector<2x4x8x128xf32>
    %cst_5 = arith.constant dense<0.000000e+00> : vector<2x4x128xf32>
    %5 = vector.multi_reduction <add>, %4, %cst_5 [2] : vector<2x4x8x128xf32> to vector<2x4x128xf32>
    %6 = vector.shape_cast %5 : vector<2x4x128xf32> to vector<2x4x1x128xf32>
    %cst_6 = arith.constant 9.99999971E-10 : f32
    %7 = vector.broadcast %cst_6 : f32 to vector<2x4x1x128xf32>
    %8 = arith.addf %6, %7 : vector<2x4x1x128xf32>
    %9 = math.rsqrt %8 : vector<2x4x1x128xf32>
    %10 = arith.mulf %6, %9 : vector<2x4x1x128xf32>
    %cst_7 = arith.constant 1.000000e+00 : f32
    %11 = vector.broadcast %cst_7 : f32 to vector<2x4x1x128xf32>
    %12 = arith.addf %11, %6 : vector<2x4x1x128xf32>
    %13 = tpu.reciprocal %12 {approx = true} : vector<2x4x1x128xf32> -> vector<2x4x1x128xf32>
    %14 = arith.mulf %10, %13 : vector<2x4x1x128xf32>
    %15 = vector.broadcast %14 : vector<2x4x1x128xf32> to vector<2x4x8x128xf32>
    %16 = arith.mulf %3, %15 : vector<2x4x8x128xf32>
    %17 = vector.shape_cast %16 : vector<2x4x8x128xf32> to vector<2x1x4x8x128xf32>
    %18 = vector.broadcast %17 : vector<2x1x4x8x128xf32> to vector<2x2x4x8x128xf32>
    %19 = arith.mulf %0, %18 : vector<2x2x4x8x128xf32>
    %cst_8 = arith.constant dense<0.000000e+00> : vector<2x2x4x128xf32>
    %20 = vector.multi_reduction <add>, %19, %cst_8 [3] : vector<2x2x4x8x128xf32> to vector<2x2x4x128xf32>
    %21 = vector.shape_cast %20 : vector<2x2x4x128xf32> to vector<2x2x4x1x128xf32>
    %cst_9 = arith.constant dense<0.000000e+00> : vector<2x4x1x128xf32>
    %22 = vector.multi_reduction <add>, %21, %cst_9 [0] : vector<2x2x4x1x128xf32> to vector<2x4x1x128xf32>
    %cst_10 = arith.constant 2.000000e+00 : f32
    %23 = vector.broadcast %cst_10 : f32 to vector<2x4x1x128xf32>
    %24 = arith.divf %22, %23 : vector<2x4x1x128xf32>
    %cst_11 = arith.constant dense<0xFF800000> : vector<4x1x128xf32>
    %25 = vector.multi_reduction <maximumf>, %24, %cst_11 [0] : vector<2x4x1x128xf32> to vector<4x1x128xf32>
    %26 = vector.shape_cast %25 : vector<4x1x128xf32> to vector<1x4x1x128xf32>
    %27 = vector.broadcast %26 : vector<1x4x1x128xf32> to vector<2x4x1x128xf32>
    %28 = arith.subf %24, %27 : vector<2x4x1x128xf32>
    %29 = math.exp %28 : vector<2x4x1x128xf32>
    %cst_12 = arith.constant dense<0.000000e+00> : vector<4x1x128xf32>
    %30 = vector.multi_reduction <add>, %29, %cst_12 [0] : vector<2x4x1x128xf32> to vector<4x1x128xf32>
    %31 = vector.shape_cast %30 : vector<4x1x128xf32> to vector<1x4x1x128xf32>
    %32 = tpu.reciprocal %31 {approx = true} : vector<1x4x1x128xf32> -> vector<1x4x1x128xf32>
    %33 = vector.broadcast %32 : vector<1x4x1x128xf32> to vector<2x4x1x128xf32>
    %34 = arith.mulf %29, %33 : vector<2x4x1x128xf32>
    %35 = vector.shape_cast %34 : vector<2x4x1x128xf32> to vector<1x2x4x1x128xf32>
    %36 = vector.broadcast %35 : vector<1x2x4x1x128xf32> to vector<2x2x4x8x128xf32>
    %37 = arith.mulf %36, %0 : vector<2x2x4x8x128xf32>
    %cst_13 = arith.constant dense<0.000000e+00> : vector<2x4x8x128xf32>
    %38 = vector.multi_reduction <add>, %37, %cst_13 [1] : vector<2x2x4x8x128xf32> to vector<2x4x8x128xf32>
    %39 = arith.mulf %38, %38 : vector<2x4x8x128xf32>
    %cst_14 = arith.constant dense<0.000000e+00> : vector<2x4x128xf32>
    %40 = vector.multi_reduction <add>, %39, %cst_14 [2] : vector<2x4x8x128xf32> to vector<2x4x128xf32>
    %41 = vector.shape_cast %40 : vector<2x4x128xf32> to vector<2x4x1x128xf32>
    %cst_15 = arith.constant 9.99999971E-10 : f32
    %42 = vector.broadcast %cst_15 : f32 to vector<2x4x1x128xf32>
    %43 = arith.addf %41, %42 : vector<2x4x1x128xf32>
    %44 = math.rsqrt %43 : vector<2x4x1x128xf32>
    %45 = arith.mulf %41, %44 : vector<2x4x1x128xf32>
    %cst_16 = arith.constant 1.000000e+00 : f32
    %46 = vector.broadcast %cst_16 : f32 to vector<2x4x1x128xf32>
    %47 = arith.addf %46, %41 : vector<2x4x1x128xf32>
    %48 = tpu.reciprocal %47 {approx = true} : vector<2x4x1x128xf32> -> vector<2x4x1x128xf32>
    %49 = arith.mulf %45, %48 : vector<2x4x1x128xf32>
    %50 = vector.broadcast %49 : vector<2x4x1x128xf32> to vector<2x4x8x128xf32>
    %51 = arith.mulf %38, %50 : vector<2x4x8x128xf32>
    %52 = vector.shape_cast %51 : vector<2x4x8x128xf32> to vector<2x1x4x8x128xf32>
    %53 = vector.broadcast %52 : vector<2x1x4x8x128xf32> to vector<2x2x4x8x128xf32>
    %54 = arith.mulf %0, %53 : vector<2x2x4x8x128xf32>
    %cst_17 = arith.constant dense<0.000000e+00> : vector<2x2x4x128xf32>
    %55 = vector.multi_reduction <add>, %54, %cst_17 [3] : vector<2x2x4x8x128xf32> to vector<2x2x4x128xf32>
    %56 = vector.shape_cast %55 : vector<2x2x4x128xf32> to vector<2x2x4x1x128xf32>
    %cst_18 = arith.constant dense<0.000000e+00> : vector<2x4x1x128xf32>
    %57 = vector.multi_reduction <add>, %56, %cst_18 [0] : vector<2x2x4x1x128xf32> to vector<2x4x1x128xf32>
    %cst_19 = arith.constant 2.000000e+00 : f32
    %58 = vector.broadcast %cst_19 : f32 to vector<2x4x1x128xf32>
    %59 = arith.divf %57, %58 : vector<2x4x1x128xf32>
    %60 = arith.addf %24, %59 : vector<2x4x1x128xf32>
    %cst_20 = arith.constant dense<0xFF800000> : vector<4x1x128xf32>
    %61 = vector.multi_reduction <maximumf>, %60, %cst_20 [0] : vector<2x4x1x128xf32> to vector<4x1x128xf32>
    %62 = vector.shape_cast %61 : vector<4x1x128xf32> to vector<1x4x1x128xf32>
    %63 = vector.broadcast %62 : vector<1x4x1x128xf32> to vector<2x4x1x128xf32>
    %64 = arith.subf %60, %63 : vector<2x4x1x128xf32>
    %65 = math.exp %64 : vector<2x4x1x128xf32>
    %cst_21 = arith.constant dense<0.000000e+00> : vector<4x1x128xf32>
    %66 = vector.multi_reduction <add>, %65, %cst_21 [0] : vector<2x4x1x128xf32> to vector<4x1x128xf32>
    %67 = vector.shape_cast %66 : vector<4x1x128xf32> to vector<1x4x1x128xf32>
    %68 = tpu.reciprocal %67 {approx = true} : vector<1x4x1x128xf32> -> vector<1x4x1x128xf32>
    %69 = vector.broadcast %68 : vector<1x4x1x128xf32> to vector<2x4x1x128xf32>
    %70 = arith.mulf %65, %69 : vector<2x4x1x128xf32>
    %71 = vector.shape_cast %70 : vector<2x4x1x128xf32> to vector<1x2x4x1x128xf32>
    %72 = vector.broadcast %71 : vector<1x2x4x1x128xf32> to vector<2x2x4x8x128xf32>
    %73 = arith.mulf %72, %0 : vector<2x2x4x8x128xf32>
    %cst_22 = arith.constant dense<0.000000e+00> : vector<2x4x8x128xf32>
    %74 = vector.multi_reduction <add>, %73, %cst_22 [1] : vector<2x2x4x8x128xf32> to vector<2x4x8x128xf32>
    %75 = arith.mulf %74, %74 : vector<2x4x8x128xf32>
    %cst_23 = arith.constant dense<0.000000e+00> : vector<2x4x128xf32>
    %76 = vector.multi_reduction <add>, %75, %cst_23 [2] : vector<2x4x8x128xf32> to vector<2x4x128xf32>
    %77 = vector.shape_cast %76 : vector<2x4x128xf32> to vector<2x4x1x128xf32>
    %cst_24 = arith.constant 9.99999971E-10 : f32
    %78 = vector.broadcast %cst_24 : f32 to vector<2x4x1x128xf32>
    %79 = arith.addf %77, %78 : vector<2x4x1x128xf32>
    %80 = math.rsqrt %79 : vector<2x4x1x128xf32>
    %81 = arith.mulf %77, %80 : vector<2x4x1x128xf32>
    %cst_25 = arith.constant 1.000000e+00 : f32
    %82 = vector.broadcast %cst_25 : f32 to vector<2x4x1x128xf32>
    %83 = arith.addf %82, %77 : vector<2x4x1x128xf32>
    %84 = tpu.reciprocal %83 {approx = true} : vector<2x4x1x128xf32> -> vector<2x4x1x128xf32>
    %85 = arith.mulf %81, %84 : vector<2x4x1x128xf32>
    %86 = vector.broadcast %85 : vector<2x4x1x128xf32> to vector<2x4x8x128xf32>
    %87 = arith.mulf %74, %86 : vector<2x4x8x128xf32>
    %c0_26 = arith.constant 0 : index
    %c0_27 = arith.constant 0 : index
    %c0_28 = arith.constant 0 : index
    %c0_29 = arith.constant 0 : index
    %88 = vector.load %arg2[%c0_26, %c0_27, %c0_28, %c0_29] : memref<2x4x8x128xf32, #tpu.memory_space<vmem>>, vector<2x4x8x128xf32>
    tpu.vector_store %arg2[%c0_26, %c0_27, %c0_28, %c0_29], %87 {strides = array<i32>} : memref<2x4x8x128xf32, #tpu.memory_space<vmem>>, vector<2x4x8x128xf32>,
    return
  }
  func.func @transform_0(%arg0: i32) -> (i32, i32, i32, i32, i32) {
    %c0_i32 = arith.constant 0 : i32
    %c0_i32_0 = arith.constant 0 : i32
    %c0_i32_1 = arith.constant 0 : i32
    %c0_i32_2 = arith.constant 0 : i32
    %c0_i32_3 = arith.constant 0 : i32
    return %c0_i32, %c0_i32_0, %c0_i32_1, %c0_i32_2, %arg0 : i32, i32, i32, i32, i32
  }
  func.func @transform_1(%arg0: i32) -> (i32, i32, i32, i32) {
    %c0_i32 = arith.constant 0 : i32
    %c0_i32_0 = arith.constant 0 : i32
    %c0_i32_1 = arith.constant 0 : i32
    %c0_i32_2 = arith.constant 0 : i32
    return %c0_i32, %c0_i32_0, %c0_i32_1, %arg0 : i32, i32, i32, i32
  }
}

</mosaic_0001>

<bundles_post_ra>
// kernel: conv_capsule_forward.1
= control target key start
LH: loop header
LB: loop body
LE: loop exit
PB: predicated region body
PF: predicated region fallthrough
CT: control target
= control target key end

     0   :  { %s1367_s0 = inlined_call_operand.vmem [shape: f32[2,2,4,8,128], index: 0, kind: input, shape index: {}]   ;;  %s1368_s1 = inlined_call_operand.vmem [shape: f32[2,4,8,128], index: 1, kind: output, shape index: {}]  }
   0x1   :  { %v962_v0 = vld [vmem:[%s1367_s0] sm:$0xff]  ;;  %v967_v1 = vld [vmem:[%s1367_s0 + $0x8] sm:$0xff]  ;;  %v972_v2 = vld [vmem:[%s1367_s0 + $0x10] sm:$0xff] }
   0x2   :  { %v977_v3 = vld [vmem:[%s1367_s0 + $0x18] sm:$0xff]  ;;  %v982_v4 = vld [vmem:[%s1367_s0 + $0x20] sm:$0xff]  ;;  %v987_v5 = vld [vmem:[%s1367_s0 + $0x28] sm:$0xff] }
   0x3   :  { %v992_v6 = vld [vmem:[%s1367_s0 + $0x30] sm:$0xff]  ;;  %v997_v7 = vld [vmem:[%s1367_s0 + $0x38] sm:$0xff]  ;;  %v1002_v8 = vld [vmem:[%s1367_s0 + $0x40] sm:$0xff]  ;;  %v24_v9 = vadd.f32 %v982_v4, %v962_v0  ;;  %v25_v10 = vadd.f32 %v987_v5, %v967_v1 }
   0x4   :  { %v1011_v11 = vld [vmem:[%s1367_s0 + $0x48] sm:$0xff]  ;;  %v1016_v12 = vld [vmem:[%s1367_s0 + $0x50] sm:$0xff]  ;;  %v1021_v13 = vld [vmem:[%s1367_s0 + $0x58] sm:$0xff]  ;;  %v26_v14 = vadd.f32 %v992_v6, %v972_v2  ;;  %v27_v15 = vadd.f32 %v997_v7, %v977_v3 }
   0x5   :  { %v1030_v16 = vld [vmem:[%s1367_s0 + $0x60] sm:$0xff]  ;;  %v1035_v17 = vld [vmem:[%s1367_s0 + $0x68] sm:$0xff]  ;;  %v1040_v18 = vld [vmem:[%s1367_s0 + $0x70] sm:$0xff]  ;;  %v1042_v19 = vmul.f32 0.5, %v24_v9  ;;  %v1044_v20 = vmul.f32 0.5, %v25_v10 }
   0x6   :  { %v1049_v21 = vld [vmem:[%s1367_s0 + $0x78] sm:$0xff]  ;;  %v28_v22 = vadd.f32 %v1030_v16, %v1002_v8  ;;  %v29_v23 = vadd.f32 %v1035_v17, %v1011_v11  ;;  %v30_v24 = vadd.f32 %v1040_v18, %v1016_v12  ;;  %v1057_v25 = vmul.f32 0.5, %v26_v14 }
   0x7   :  { %v31_v26 = vadd.f32 %v1049_v21, %v1021_v13  ;;  %v1061_v27 = vmul.f32 0.5, %v27_v15  ;;  %v40_v28 = vmul.f32 %v1042_v19, %v1042_v19  ;;  %v41_v29 = vmul.f32 %v1044_v20, %v1044_v20 }
   0x8   :  { %v1067_v30 = vmul.f32 0.5, %v28_v22  ;;  %v1069_v31 = vmul.f32 0.5, %v29_v23  ;;  %v1071_v32 = vmul.f32 0.5, %v30_v24  ;;  %v42_v33 = vmul.f32 %v1057_v25, %v1057_v25 }
   0x9   :  { %v1075_v34 = vmul.f32 0.5, %v31_v26  ;;  %v43_v35 = vmul.f32 %v1061_v27, %v1061_v27  ;;  %v48_v36 = vrot.slane %v40_v28, 4  ;;  %v54_v37 = vrot.slane %v41_v29, 4 }
   0xa   :  { %v44_v38 = vmul.f32 %v1067_v30, %v1067_v30  ;;  %v45_v39 = vmul.f32 %v1069_v31, %v1069_v31  ;;  %v46_v40 = vmul.f32 %v1071_v32, %v1071_v32  ;;  %v60_v41 = vrot.slane %v42_v33, 4 }
   0xb   :  { %v47_v42 = vmul.f32 %v1075_v34, %v1075_v34  ;;  %v49_v43 = vadd.f32 %v48_v36, %v40_v28  ;;  %v55_v44 = vadd.f32 %v54_v37, %v41_v29  ;;  %v66_v45 = vrot.slane %v43_v35, 4 }
   0xc   :  { %v61_v46 = vadd.f32 %v60_v41, %v42_v33  ;;  %v72_v47 = vrot.slane %v44_v38, 4  ;;  %v78_v48 = vrot.slane %v45_v39, 4  ;;  %v84_v49 = vrot.slane %v46_v40, 4 }
   0xd   :  { %v50_v50 = vrot.slane %v49_v43, 2  ;;  %v56_v51 = vrot.slane %v55_v44, 2  ;;  %v67_v52 = vadd.f32 %v66_v45, %v43_v35  ;;  %v90_v53 = vrot.slane %v47_v42, 4 }
   0xe   :  { %v62_v54 = vrot.slane %v61_v46, 2  ;;  %v73_v55 = vadd.f32 %v72_v47, %v44_v38  ;;  %v79_v56 = vadd.f32 %v78_v48, %v45_v39  ;;  %v85_v57 = vadd.f32 %v84_v49, %v46_v40 }
   0xf   :  { %v51_v58 = vadd.f32 %v50_v50, %v49_v43  ;;  %v57_v59 = vadd.f32 %v56_v51, %v55_v44  ;;  %v68_v60 = vrot.slane %v67_v52, 2  ;;  %v91_v61 = vadd.f32 %v90_v53, %v47_v42 }
  0x10   :  { %v63_v62 = vadd.f32 %v62_v54, %v61_v46  ;;  %v74_v63 = vrot.slane %v73_v55, 2  ;;  %v80_v9 = vrot.slane %v79_v56, 2  ;;  %v86_v10 = vrot.slane %v85_v57, 2 }
  0x11   :  { %v52_v14 = vrot.slane %v51_v58, 1  ;;  %v58_v15 = vrot.slane %v57_v59, 1  ;;  %v69_v22 = vadd.f32 %v68_v60, %v67_v52  ;;  %v92_v23 = vrot.slane %v91_v61, 2 }
  0x12   :  { %v64_v24 = vrot.slane %v63_v62, 1  ;;  %v75_v26 = vadd.f32 %v74_v63, %v73_v55  ;;  %v81_v28 = vadd.f32 %v80_v9, %v79_v56  ;;  %v87_v29 = vadd.f32 %v86_v10, %v85_v57 }
  0x13   :  { %v53_v33 = vadd.f32 %v52_v14, %v51_v58  ;;  %v59_v35 = vadd.f32 %v58_v15, %v57_v59  ;;  %v70_v36 = vrot.slane %v69_v22, 1  ;;  %v93_v37 = vadd.f32 %v92_v23, %v91_v61 }
  0x14   :  { %v65_v38 = vadd.f32 %v64_v24, %v63_v62  ;;  %v76_v39 = vrot.slane %v75_v26, 1  ;;  %v82_v40 = vrot.slane %v81_v28, 1  ;;  %v88_v41 = vrot.slane %v87_v29, 1 }
  0x15   :  { %v71_v42 = vadd.f32 %v70_v36, %v69_v22  ;;  %v94_v43 = vrot.slane %v93_v37, 1  ;;  %v96_v44 = vadd.f32 1e-09, %v53_v33  ;;  %v97_v45 = vadd.f32 1e-09, %v59_v35 }
  0x16   :  { %v77_v46 = vadd.f32 %v76_v39, %v75_v26  ;;  %v83_v47 = vadd.f32 %v82_v40, %v81_v28  ;;  %v89_v48 = vadd.f32 %v88_v41, %v87_v29  ;;  %v98_v49 = vadd.f32 1e-09, %v65_v38 }
  0x17   :  { %v95_v50 = vadd.f32 %v94_v43, %v93_v37  ;;  %v99_v51 = vadd.f32 1e-09, %v71_v42  ;;  %789 = vrsqrt.f32 %v96_v44  ;;  %v120_v56 = vadd.f32 1.0, %v53_v33 }
  0x18   :  { %v100_v52 = vadd.f32 1e-09, %v77_v46  ;;  %v101_v53 = vadd.f32 1e-09, %v83_v47  ;;  %791 = vrsqrt.f32 %v97_v45  ;;  %v102_v54 = vadd.f32 1e-09, %v89_v48 }
  0x19   :  { %793 = vrsqrt.f32 %v98_v49  ;;  %v103_v55 = vadd.f32 1e-09, %v95_v50  ;;  %v121_v57 = vadd.f32 1.0, %v59_v35  ;;  %v122_v58 = vadd.f32 1.0, %v65_v38 }
  0x1a   :  { %795 = vrsqrt.f32 %v99_v51  ;;  %v123_v59 = vadd.f32 1.0, %v71_v42  ;;  %v124_v60 = vadd.f32 1.0, %v77_v46  ;;  %v125_v61 = vadd.f32 1.0, %v83_v47 }
  0x1b   :  { %797 = vrsqrt.f32 %v100_v52  ;;  %v126_v63 = vadd.f32 1.0, %v89_v48  ;;  %v127_v10 = vadd.f32 1.0, %v95_v50 }
  0x1c   :  { %799 = vrsqrt.f32 %v101_v53 }
  0x1d   :  { %801 = vrsqrt.f32 %v102_v54 }
  0x1e   :  { %803 = vrsqrt.f32 %v103_v55 }
  0x1f   :  { %805 = vrcp.f32 %v120_v56 }
  0x20   :  { %807 = vrcp.f32 %v121_v57 }
  0x21   :  { %v790_v62 = vpop.eup %789  ;;  %809 = vrcp.f32 %v122_v58 }
  0x22   :  { %v792_v9 = vpop.eup %791  ;;  %811 = vrcp.f32 %v123_v59  ;;  %v112_v24 = vmul.f32 %v790_v62, %v53_v33 }
  0x23   :  { %v794_v14 = vpop.eup %793  ;;  %813 = vrcp.f32 %v124_v60  ;;  %v113_v28 = vmul.f32 %v792_v9, %v59_v35 }
  0x24   :  { %v796_v15 = vpop.eup %795  ;;  %815 = vrcp.f32 %v125_v61  ;;  %v114_v36 = vmul.f32 %v794_v14, %v65_v38 }
  0x25   :  { %v798_v22 = vpop.eup %797  ;;  %817 = vrcp.f32 %v126_v63  ;;  %v115_v39 = vmul.f32 %v796_v15, %v71_v42 }
  0x26   :  { %v800_v23 = vpop.eup %799  ;;  %819 = vrcp.f32 %v127_v10  ;;  %v116_v41 = vmul.f32 %v798_v22, %v77_v46 }
  0x27   :  { %v802_v26 = vpop.eup %801  ;;  %v117_v45 = vmul.f32 %v800_v23, %v83_v47 }
  0x28   :  { %v804_v29 = vpop.eup %803  ;;  %v118_v52 = vmul.f32 %v802_v26, %v89_v48 }
  0x29   :  { %v806_v37 = vpop.eup %805  ;;  %v119_v33 = vmul.f32 %v804_v29, %v95_v50 }
  0x2a   :  { %v808_v40 = vpop.eup %807  ;;  %v136_v43 = vmul.f32 %v806_v37, %v112_v24 }
  0x2b   :  { %v810_v44 = vpop.eup %809  ;;  %v137_v49 = vmul.f32 %v808_v40, %v113_v28 }
  0x2c   :  { %v812_v51 = vpop.eup %811  ;;  %v138_v53 = vmul.f32 %v810_v44, %v114_v36  ;;  %v144_v54 = vmul.f32 %v136_v43, %v1042_v19 }
  0x2d   :  { %v814_v55 = vpop.eup %813  ;;  %v139_v56 = vmul.f32 %v812_v51, %v115_v39  ;;  %v145_v35 = vmul.f32 %v137_v49, %v1044_v20 }
  0x2e   :  { %v816_v57 = vpop.eup %815  ;;  %v140_v38 = vmul.f32 %v814_v55, %v116_v41  ;;  %v146_v42 = vmul.f32 %v138_v53, %v1057_v25  ;;  %v152_v46 = vmul.f32 %v144_v54, %v962_v0  ;;  %v156_v58 = vmul.f32 %v144_v54, %v982_v4 }
  0x2f   :  { %v818_v47 = vpop.eup %817  ;;  %v141_v59 = vmul.f32 %v816_v57, %v117_v45  ;;  %v147_v48 = vmul.f32 %v139_v56, %v1061_v27  ;;  %v153_v60 = vmul.f32 %v145_v35, %v967_v1  ;;  %v157_v19 = vmul.f32 %v145_v35, %v987_v5 }
  0x30   :  { %v820_v50 = vpop.eup %819  ;;  %v142_v61 = vmul.f32 %v818_v47, %v118_v52  ;;  %v148_v20 = vmul.f32 %v140_v38, %v1067_v30  ;;  %v154_v62 = vmul.f32 %v146_v42, %v972_v2  ;;  %v158_v25 = vmul.f32 %v146_v42, %v992_v6 }
  0x31   :  { %v143_v63 = vmul.f32 %v820_v50, %v119_v33  ;;  %v149_v9 = vmul.f32 %v141_v59, %v1069_v31  ;;  %v155_v10 = vmul.f32 %v147_v48, %v977_v3  ;;  %v159_v14 = vmul.f32 %v147_v48, %v997_v7 }
  0x32   :  { %v150_v27 = vmul.f32 %v142_v61, %v1071_v32  ;;  %v160_v15 = vmul.f32 %v148_v20, %v1002_v8  ;;  %v1104_v22 = vmul.f32 %v148_v20, %v1030_v16  ;;  %v168_v23 = vrot.slane %v152_v46, 4 }
  0x33   :  { %v151_v30 = vmul.f32 %v143_v63, %v1075_v34  ;;  %v161_v24 = vmul.f32 %v149_v9, %v1011_v11  ;;  %v1109_v26 = vmul.f32 %v149_v9, %v1035_v17  ;;  %v174_v31 = vrot.slane %v153_v60, 4 }
  0x34   :  { %v162_v28 = vmul.f32 %v150_v27, %v1016_v12  ;;  %v1113_v29 = vmul.f32 %v150_v27, %v1040_v18  ;;  %v169_v32 = vadd.f32 %v168_v23, %v152_v46  ;;  %v180_v36 = vrot.slane %v154_v62, 4 }
  0x35   :  { %v163_v37 = vmul.f32 %v151_v30, %v1021_v13  ;;  %v1117_v39 = vmul.f32 %v151_v30, %v1049_v21  ;;  %v175_v40 = vadd.f32 %v174_v31, %v153_v60  ;;  %v186_v34 = vrot.slane %v155_v10, 4 }
  0x36   :  { %v170_v41 = vrot.slane %v169_v32, 2  ;;  %v181_v43 = vadd.f32 %v180_v36, %v154_v62  ;;  %v192_v44 = vrot.slane %v156_v58, 4  ;;  %v198_v45 = vrot.slane %v157_v19, 4 }
  0x37   :  { %v176_v49 = vrot.slane %v175_v40, 2  ;;  %v187_v51 = vadd.f32 %v186_v34, %v155_v10  ;;  %v204_v52 = vrot.slane %v158_v25, 4  ;;  %v210_v53 = vrot.slane %v159_v14, 4 }
  0x38   :  { %v171_v54 = vadd.f32 %v170_v41, %v169_v32  ;;  %v182_v55 = vrot.slane %v181_v43, 2  ;;  %v193_v33 = vadd.f32 %v192_v44, %v156_v58  ;;  %v199_v56 = vadd.f32 %v198_v45, %v157_v19 }
  0x39   :  { %v177_v35 = vadd.f32 %v176_v49, %v175_v40  ;;  %v188_v57 = vrot.slane %v187_v51, 2  ;;  %v205_v38 = vadd.f32 %v204_v52, %v158_v25  ;;  %v211_v42 = vadd.f32 %v210_v53, %v159_v14 }
  0x3a   :  { %v172_v46 = vrot.slane %v171_v54, 1  ;;  %v183_v47 = vadd.f32 %v182_v55, %v181_v43  ;;  %v194_v59 = vrot.slane %v193_v33, 2  ;;  %v200_v48 = vrot.slane %v199_v56, 2 }
  0x3b   :  { %v178_v60 = vrot.slane %v177_v35, 1  ;;  %v189_v50 = vadd.f32 %v188_v57, %v187_v51  ;;  %v206_v61 = vrot.slane %v205_v38, 2  ;;  %v212_v20 = vrot.slane %v211_v42, 2 }
  0x3c   :  { %v173_v62 = vadd.f32 %v172_v46, %v171_v54  ;;  %v184_v63 = vrot.slane %v183_v47, 1  ;;  %v195_v9 = vadd.f32 %v194_v59, %v193_v33  ;;  %v201_v10 = vadd.f32 %v200_v48, %v199_v56 }
  0x3d   :  { %v179_v27 = vadd.f32 %v178_v60, %v177_v35  ;;  %v190_v23 = vrot.slane %v189_v50, 1  ;;  %v207_v58 = vadd.f32 %v206_v61, %v205_v38  ;;  %v213_v19 = vadd.f32 %v212_v20, %v211_v42 }
  0x3e   :  { %v185_v30 = vadd.f32 %v184_v63, %v183_v47  ;;  %v196_v31 = vrot.slane %v195_v9, 1  ;;  %v202_v25 = vrot.slane %v201_v10, 1  ;;  %v216_v14 = vrot.slane %v160_v15, 4 }
  0x3f   :  { %v191_v32 = vadd.f32 %v190_v23, %v189_v50  ;;  %v208_v36 = vrot.slane %v207_v58, 1  ;;  %v214_v40 = vrot.slane %v213_v19, 1  ;;  %v222_v34 = vrot.slane %v161_v24, 4 }
  0x40   :  { %v197_v41 = vadd.f32 %v196_v31, %v195_v9  ;;  %v203_v43 = vadd.f32 %v202_v25, %v201_v10  ;;  %v217_v44 = vadd.f32 %v216_v14, %v160_v15  ;;  %v228_v45 = vrot.slane %v162_v28, 4 }
  0x41   :  { %v209_v49 = vadd.f32 %v208_v36, %v207_v58  ;;  %v215_v51 = vadd.f32 %v214_v40, %v213_v19  ;;  %v223_v52 = vadd.f32 %v222_v34, %v161_v24  ;;  %v234_v53 = vrot.slane %v163_v37, 4 }
  0x42   :  { %v218_v54 = vrot.slane %v217_v44, 2  ;;  %v229_v55 = vadd.f32 %v228_v45, %v162_v28  ;;  %v240_v33 = vrot.slane %v1104_v22, 4  ;;  %v246_v56 = vrot.slane %v1109_v26, 4 }
  0x43   :  { %v224_v35 = vrot.slane %v223_v52, 2  ;;  %v235_v57 = vadd.f32 %v234_v53, %v163_v37  ;;  %v252_v38 = vrot.slane %v1113_v29, 4  ;;  %v258_v42 = vrot.slane %v1117_v39, 4 }
  0x44   :  { %v219_v46 = vadd.f32 %v218_v54, %v217_v44  ;;  %v230_v47 = vrot.slane %v229_v55, 2  ;;  %v241_v15 = vadd.f32 %v240_v33, %v1104_v22  ;;  %v247_v59 = vadd.f32 %v246_v56, %v1109_v26 }
  0x45   :  { %v225_v24 = vadd.f32 %v224_v35, %v223_v52  ;;  %v236_v48 = vrot.slane %v235_v57, 2  ;;  %v253_v28 = vadd.f32 %v252_v38, %v1113_v29  ;;  %v259_v60 = vadd.f32 %v258_v42, %v1117_v39 }
  0x46   :  { %v220_v50 = vrot.slane %v219_v46, 1  ;;  %v231_v61 = vadd.f32 %v230_v47, %v229_v55  ;;  %v242_v20 = vrot.slane %v241_v15, 2  ;;  %v248_v37 = vrot.slane %v247_v59, 2 }
  0x47   :  { %v226_v63 = vrot.slane %v225_v24, 1  ;;  %v237_v9 = vadd.f32 %v236_v48, %v235_v57  ;;  %v254_v10 = vrot.slane %v253_v28, 2  ;;  %v260_v23 = vrot.slane %v259_v60, 2 }
  0x48   :  { %v221_v58 = vadd.f32 %v220_v50, %v219_v46  ;;  %v232_v19 = vrot.slane %v231_v61, 1  ;;  %v243_v31 = vadd.f32 %v242_v20, %v241_v15  ;;  %v249_v22 = vadd.f32 %v248_v37, %v247_v59 }
  0x49   :  { %v227_v25 = vadd.f32 %v226_v63, %v225_v24  ;;  %v238_v26 = vrot.slane %v237_v9, 1  ;;  %v255_v14 = vadd.f32 %v254_v10, %v253_v28  ;;  %v261_v36 = vadd.f32 %v260_v23, %v259_v60 }
  0x4a   :  { %v233_v40 = vadd.f32 %v232_v19, %v231_v61  ;;  %v244_v29 = vrot.slane %v243_v31, 1  ;;  %v250_v34 = vrot.slane %v249_v22, 1  ;;  %v264_v39 = vadd.f32 %v221_v58, %v173_v62 }
  0x4b   :  { %v239_v44 = vadd.f32 %v238_v26, %v237_v9  ;;  %v256_v45 = vrot.slane %v255_v14, 1  ;;  %v262_v52 = vrot.slane %v261_v36, 1  ;;  %v265_v53 = vadd.f32 %v227_v25, %v179_v27 }
  0x4c   :  { %v245_v54 = vadd.f32 %v244_v29, %v243_v31  ;;  %v251_v55 = vadd.f32 %v250_v34, %v249_v22  ;;  %v266_v33 = vadd.f32 %v233_v40, %v185_v30  ;;  %v1127_v46 = vmul.f32 0.5, %v264_v39 }
  0x4d   :  { %v257_v56 = vadd.f32 %v256_v45, %v255_v14  ;;  %v263_v35 = vadd.f32 %v262_v52, %v261_v36  ;;  %v267_v57 = vadd.f32 %v239_v44, %v191_v32  ;;  %v1129_v47 = vmul.f32 0.5, %v265_v53 }
  0x4e   :  { %v268_v38 = vadd.f32 %v245_v54, %v197_v41  ;;  %v269_v42 = vadd.f32 %v251_v55, %v203_v43  ;;  %v1131_v24 = vmul.f32 0.5, %v266_v33 }
  0x4f   :  { %v270_v15 = vadd.f32 %v257_v56, %v209_v49  ;;  %v271_v59 = vadd.f32 %v263_v35, %v215_v51  ;;  %v1133_v62 = vmul.f32 0.5, %v267_v57 }
  0x50   :  { %v1135_v48 = vmul.f32 0.5, %v268_v38  ;;  %v1137_v27 = vmul.f32 0.5, %v269_v42 }
  0x51   :  { %v1139_v30 = vmul.f32 0.5, %v270_v15  ;;  %v1141_v28 = vmul.f32 0.5, %v271_v59 }
  0x52   :  { %1373 = vst [vmem:[#allocation2_spill] sm:$0xff] %v1135_v48  ;;  %1374 = vst [vmem:[#allocation3_spill] sm:$0xff] %v1137_v27  ;;  %v281_v32 = vmax.f32 %v1127_v46, %v1135_v48  ;;  %v282_v41 = vmax.f32 %v1129_v47, %v1137_v27 }
  0x53   :  { %1375 = vst [vmem:[#allocation4_spill] sm:$0xff] %v1139_v30  ;;  %1376 = vst [vmem:[#allocation5_spill] sm:$0xff] %v1141_v28  ;;  %v283_v43 = vmax.f32 %v1131_v24, %v1139_v30  ;;  %v284_v49 = vmax.f32 %v1133_v62, %v1141_v28 }
  0x54   :  { %v285_v51 = vsub.f32 %v1127_v46, %v281_v32  ;;  %v286_v60 = vsub.f32 %v1129_v47, %v282_v41  ;;  %v289_v50 = vsub.f32 %v1135_v48, %v281_v32  ;;  %v290_v37 = vsub.f32 %v1137_v27, %v282_v41 }
  0x55   :  { %v287_v61 = vsub.f32 %v1131_v24, %v283_v43  ;;  %v288_v20 = vsub.f32 %v1133_v62, %v284_v49  ;;  %v291_v63 = vsub.f32 %v1139_v30, %v283_v43  ;;  %v292_v23 = vsub.f32 %v1141_v28, %v284_v49 }
  0x56   :  { %v293_v9 = vmul.f32 1.442695, %v285_v51  ;;  %v295_v10 = vmul.f32 1.442695, %v286_v60  ;;  %v301_v31 = vmul.f32 1.442695, %v289_v50 }
  0x57   :  { %v297_v58 = vmul.f32 1.442695, %v287_v61  ;;  %v299_v19 = vmul.f32 1.442695, %v288_v20  ;;  %v303_v22 = vmul.f32 1.442695, %v290_v37 }
  0x58   :  { %821 = vpow2.f32 %v293_v9  ;;  %v305_v25 = vmul.f32 1.442695, %v291_v63  ;;  %v307_v26 = vmul.f32 1.442695, %v292_v23 }
  0x59   :  { %823 = vpow2.f32 %v295_v10 }
  0x5a   :  { %825 = vpow2.f32 %v297_v58 }
  0x5b   :  { %827 = vpow2.f32 %v299_v19 }
  0x5c   :  { %829 = vpow2.f32 %v301_v31 }
  0x5d   :  { %831 = vpow2.f32 %v303_v22 }
  0x5e   :  { %833 = vpow2.f32 %v305_v25 }
  0x5f   :  { %835 = vpow2.f32 %v307_v26 }
  0x62   :  { %v822_v14 = vpop.eup %821 }
  0x63   :  { %v824_v36 = vpop.eup %823 }
  0x64   :  { %v826_v40 = vpop.eup %825 }
  0x65   :  { %v828_v29 = vpop.eup %827 }
  0x66   :  { %v830_v34 = vpop.eup %829 }
  0x67   :  { %v832_v39 = vpop.eup %831  ;;  %v309_v44 = vadd.f32 %v830_v34, %v822_v14 }
  0x68   :  { %v834_v45 = vpop.eup %833  ;;  %v310_v52 = vadd.f32 %v832_v39, %v824_v36 }
  0x69   :  { %v836_v53 = vpop.eup %835  ;;  %v311_v54 = vadd.f32 %v834_v45, %v826_v40  ;;  %837 = vrcp.f32 %v309_v44 }
  0x6a   :  { %v312_v55 = vadd.f32 %v836_v53, %v828_v29  ;;  %839 = vrcp.f32 %v310_v52 }
  0x6b   :  { %841 = vrcp.f32 %v311_v54 }
  0x6c   :  { %843 = vrcp.f32 %v312_v55 }
  0x73   :  { %v838_v33 = vpop.eup %837 }
  0x74   :  { %v840_v56 = vpop.eup %839  ;;  %v317_v35 = vmul.f32 %v838_v33, %v822_v14  ;;  %v321_v57 = vmul.f32 %v838_v33, %v830_v34 }
  0x75   :  { %v842_v38 = vpop.eup %841  ;;  %v318_v42 = vmul.f32 %v840_v56, %v824_v36  ;;  %v322_v15 = vmul.f32 %v840_v56, %v832_v39 }
  0x76   :  { %v844_v59 = vpop.eup %843  ;;  %v319_v32 = vmul.f32 %v842_v38, %v826_v40  ;;  %v323_v41 = vmul.f32 %v842_v38, %v834_v45  ;;  %v325_v43 = vmul.f32 %v317_v35, %v962_v0  ;;  %v329_v49 = vmul.f32 %v321_v57, %v982_v4 }
  0x77   :  { %v320_v51 = vmul.f32 %v844_v59, %v828_v29  ;;  %v324_v60 = vmul.f32 %v844_v59, %v836_v53  ;;  %v326_v50 = vmul.f32 %v318_v42, %v967_v1  ;;  %v330_v61 = vmul.f32 %v322_v15, %v987_v5 }
  0x78   :  { %v327_v20 = vmul.f32 %v319_v32, %v972_v2  ;;  %v331_v37 = vmul.f32 %v323_v41, %v992_v6  ;;  %v333_v63 = vmul.f32 %v317_v35, %v1002_v8  ;;  %v334_v9 = vmul.f32 %v318_v42, %v1011_v11 }
  0x79   :  { %v328_v10 = vmul.f32 %v320_v51, %v977_v3  ;;  %v332_v23 = vmul.f32 %v324_v60, %v997_v7  ;;  %v335_v58 = vmul.f32 %v319_v32, %v1016_v12  ;;  %v336_v19 = vmul.f32 %v320_v51, %v1021_v13 }
  0x7a   :  { %v337_v31 = vmul.f32 %v321_v57, %v1030_v16  ;;  %v338_v22 = vmul.f32 %v322_v15, %v1035_v17  ;;  %v339_v25 = vmul.f32 %v323_v41, %v1040_v18  ;;  %v340_v26 = vmul.f32 %v324_v60, %v1049_v21 }
  0x7b   :  { %v1175_v14 = vadd.f32 %v329_v49, %v325_v43  ;;  %v1177_v36 = vadd.f32 %v330_v61, %v326_v50  ;;  %v1179_v40 = vadd.f32 %v331_v37, %v327_v20  ;;  %v1181_v29 = vadd.f32 %v332_v23, %v328_v10 }
  0x7c   :  { %v1183_v34 = vadd.f32 %v337_v31, %v333_v63  ;;  %v1185_v39 = vadd.f32 %v338_v22, %v334_v9  ;;  %v1187_v44 = vadd.f32 %v339_v25, %v335_v58  ;;  %v1189_v45 = vadd.f32 %v340_v26, %v336_v19 }
  0x7d   :  { %v349_v52 = vmul.f32 %v1175_v14, %v1175_v14  ;;  %v350_v53 = vmul.f32 %v1177_v36, %v1177_v36  ;;  %v351_v54 = vmul.f32 %v1179_v40, %v1179_v40  ;;  %v352_v55 = vmul.f32 %v1181_v29, %v1181_v29 }
  0x7e   :  { %v353_v33 = vmul.f32 %v1183_v34, %v1183_v34  ;;  %v354_v56 = vmul.f32 %v1185_v39, %v1185_v39  ;;  %v355_v35 = vmul.f32 %v1187_v44, %v1187_v44  ;;  %v356_v57 = vmul.f32 %v1189_v45, %v1189_v45 }
  0x7f   :  { %v357_v38 = vrot.slane %v349_v52, 4  ;;  %v363_v42 = vrot.slane %v350_v53, 4  ;;  %v369_v15 = vrot.slane %v351_v54, 4  ;;  %v375_v59 = vrot.slane %v352_v55, 4 }
  0x80   :  { %v381_v32 = vrot.slane %v353_v33, 4  ;;  %v387_v41 = vrot.slane %v354_v56, 4  ;;  %v393_v43 = vrot.slane %v355_v35, 4  ;;  %v399_v49 = vrot.slane %v356_v57, 4 }
  0x81   :  { %v358_v51 = vadd.f32 %v357_v38, %v349_v52  ;;  %v364_v60 = vadd.f32 %v363_v42, %v350_v53  ;;  %v370_v50 = vadd.f32 %v369_v15, %v351_v54  ;;  %v376_v61 = vadd.f32 %v375_v59, %v352_v55 }
  0x82   :  { %v382_v20 = vadd.f32 %v381_v32, %v353_v33  ;;  %v388_v37 = vadd.f32 %v387_v41, %v354_v56  ;;  %v394_v63 = vadd.f32 %v393_v43, %v355_v35  ;;  %v400_v9 = vadd.f32 %v399_v49, %v356_v57 }
  0x83   :  { %v359_v10 = vrot.slane %v358_v51, 2  ;;  %v365_v23 = vrot.slane %v364_v60, 2  ;;  %v371_v58 = vrot.slane %v370_v50, 2  ;;  %v377_v19 = vrot.slane %v376_v61, 2 }
  0x84   :  { %v383_v31 = vrot.slane %v382_v20, 2  ;;  %v389_v22 = vrot.slane %v388_v37, 2  ;;  %v395_v25 = vrot.slane %v394_v63, 2  ;;  %v401_v26 = vrot.slane %v400_v9, 2 }
  0x85   :  { %v360_v28 = vadd.f32 %v359_v10, %v358_v51  ;;  %v366_v30 = vadd.f32 %v365_v23, %v364_v60  ;;  %v372_v27 = vadd.f32 %v371_v58, %v370_v50  ;;  %v378_v48 = vadd.f32 %v377_v19, %v376_v61 }
  0x86   :  { %v384_v52 = vadd.f32 %v383_v31, %v382_v20  ;;  %v390_v53 = vadd.f32 %v389_v22, %v388_v37  ;;  %v396_v54 = vadd.f32 %v395_v25, %v394_v63  ;;  %v402_v55 = vadd.f32 %v401_v26, %v400_v9 }
  0x87   :  { %v361_v33 = vrot.slane %v360_v28, 1  ;;  %v367_v56 = vrot.slane %v366_v30, 1  ;;  %v373_v35 = vrot.slane %v372_v27, 1  ;;  %v379_v57 = vrot.slane %v378_v48, 1 }
  0x88   :  { %v385_v38 = vrot.slane %v384_v52, 1  ;;  %v391_v42 = vrot.slane %v390_v53, 1  ;;  %v397_v15 = vrot.slane %v396_v54, 1  ;;  %v403_v59 = vrot.slane %v402_v55, 1 }
  0x89   :  { %v362_v32 = vadd.f32 %v361_v33, %v360_v28  ;;  %v368_v41 = vadd.f32 %v367_v56, %v366_v30  ;;  %v374_v43 = vadd.f32 %v373_v35, %v372_v27  ;;  %v380_v49 = vadd.f32 %v379_v57, %v378_v48 }
  0x8a   :  { %v386_v51 = vadd.f32 %v385_v38, %v384_v52  ;;  %v392_v60 = vadd.f32 %v391_v42, %v390_v53  ;;  %v398_v50 = vadd.f32 %v397_v15, %v396_v54  ;;  %v404_v63 = vadd.f32 %v403_v59, %v402_v55 }
  0x8b   :  { %v405_v61 = vadd.f32 1e-09, %v362_v32  ;;  %v406_v20 = vadd.f32 1e-09, %v368_v41  ;;  %v407_v37 = vadd.f32 1e-09, %v374_v43 }
  0x8c   :  { %v408_v9 = vadd.f32 1e-09, %v380_v49  ;;  %v409_v10 = vadd.f32 1e-09, %v386_v51  ;;  %v410_v23 = vadd.f32 1e-09, %v392_v60 }
  0x8d   :  { %845 = vrsqrt.f32 %v405_v61  ;;  %v411_v58 = vadd.f32 1e-09, %v398_v50  ;;  %v412_v19 = vadd.f32 1e-09, %v404_v63  ;;  %v429_v30 = vadd.f32 1.0, %v362_v32 }
  0x8e   :  { %847 = vrsqrt.f32 %v406_v20  ;;  %v430_v48 = vadd.f32 1.0, %v368_v41  ;;  %v431_v27 = vadd.f32 1.0, %v374_v43  ;;  %v432_v28 = vadd.f32 1.0, %v380_v49 }
  0x8f   :  { %849 = vrsqrt.f32 %v407_v37  ;;  %v433_v31 = vadd.f32 1.0, %v386_v51  ;;  %v434_v22 = vadd.f32 1.0, %v392_v60  ;;  %v435_v26 = vadd.f32 1.0, %v398_v50 }
  0x90   :  { %851 = vrsqrt.f32 %v408_v9  ;;  %v436_v53 = vadd.f32 1.0, %v404_v63 }
  0x91   :  { %853 = vrsqrt.f32 %v409_v10 }
  0x92   :  { %855 = vrsqrt.f32 %v410_v23 }
  0x93   :  { %857 = vrsqrt.f32 %v411_v58 }
  0x94   :  { %859 = vrsqrt.f32 %v412_v19 }
  0x95   :  { %861 = vrcp.f32 %v429_v30 }
  0x96   :  { %863 = vrcp.f32 %v430_v48 }
  0x97   :  { %v846_v25 = vpop.eup %845  ;;  %865 = vrcp.f32 %v431_v27 }
  0x98   :  { %v848_v52 = vpop.eup %847  ;;  %867 = vrcp.f32 %v432_v28  ;;  %v421_v35 = vmul.f32 %v846_v25, %v362_v32 }
  0x99   :  { %v850_v54 = vpop.eup %849  ;;  %869 = vrcp.f32 %v433_v31  ;;  %v422_v38 = vmul.f32 %v848_v52, %v368_v41 }
  0x9a   :  { %v852_v55 = vpop.eup %851  ;;  %871 = vrcp.f32 %v434_v22  ;;  %v423_v15 = vmul.f32 %v850_v54, %v374_v43 }
  0x9b   :  { %v854_v33 = vpop.eup %853  ;;  %873 = vrcp.f32 %v435_v26  ;;  %v424_v61 = vmul.f32 %v852_v55, %v380_v49 }
  0x9c   :  { %v856_v56 = vpop.eup %855  ;;  %875 = vrcp.f32 %v436_v53  ;;  %v425_v37 = vmul.f32 %v854_v33, %v386_v51 }
  0x9d   :  { %v858_v57 = vpop.eup %857  ;;  %v426_v23 = vmul.f32 %v856_v56, %v392_v60 }
  0x9e   :  { %v860_v42 = vpop.eup %859  ;;  %v427_v30 = vmul.f32 %v858_v57, %v398_v50 }
  0x9f   :  { %v862_v59 = vpop.eup %861  ;;  %v428_v32 = vmul.f32 %v860_v42, %v404_v63 }
  0xa0   :  { %v864_v20 = vpop.eup %863  ;;  %v445_v9 = vmul.f32 %v862_v59, %v421_v35 }
  0xa1   :  { %v866_v10 = vpop.eup %865  ;;  %v446_v58 = vmul.f32 %v864_v20, %v422_v38 }
  0xa2   :  { %v868_v19 = vpop.eup %867  ;;  %v447_v48 = vmul.f32 %v866_v10, %v423_v15  ;;  %v453_v27 = vmul.f32 %v445_v9, %v1175_v14 }
  0xa3   :  { %v870_v28 = vpop.eup %869  ;;  %v448_v31 = vmul.f32 %v868_v19, %v424_v61  ;;  %v454_v41 = vmul.f32 %v446_v58, %v1177_v36 }
  0xa4   :  { %v872_v22 = vpop.eup %871  ;;  %v449_v43 = vmul.f32 %v870_v28, %v425_v37  ;;  %v455_v49 = vmul.f32 %v447_v48, %v1179_v40  ;;  %v461_v51 = vmul.f32 %v453_v27, %v962_v0  ;;  %v465_v25 = vmul.f32 %v453_v27, %v982_v4 }
  0xa5   :  { %v874_v60 = vpop.eup %873  ;;  %v450_v26 = vmul.f32 %v872_v22, %v426_v23  ;;  %v456_v50 = vmul.f32 %v448_v31, %v1181_v29  ;;  %v462_v52 = vmul.f32 %v454_v41, %v967_v1  ;;  %v466_v14 = vmul.f32 %v454_v41, %v987_v5 }
  0xa6   :  { %v876_v63 = vpop.eup %875  ;;  %v451_v53 = vmul.f32 %v874_v60, %v427_v30  ;;  %v457_v36 = vmul.f32 %v449_v43, %v1183_v34  ;;  %v463_v54 = vmul.f32 %v455_v49, %v972_v2  ;;  %v467_v40 = vmul.f32 %v455_v49, %v992_v6 }
  0xa7   :  { %v452_v55 = vmul.f32 %v876_v63, %v428_v32  ;;  %v458_v0 = vmul.f32 %v450_v26, %v1185_v39  ;;  %v464_v4 = vmul.f32 %v456_v50, %v977_v3  ;;  %v468_v33 = vmul.f32 %v456_v50, %v997_v7 }
  0xa8   :  { %v459_v29 = vmul.f32 %v451_v53, %v1187_v44  ;;  %v469_v1 = vmul.f32 %v457_v36, %v1002_v8  ;;  %v1224_v5 = vmul.f32 %v457_v36, %v1030_v16  ;;  %v477_v56 = vrot.slane %v461_v51, 4 }
  0xa9   :  { %v460_v34 = vmul.f32 %v452_v55, %v1189_v45  ;;  %v470_v2 = vmul.f32 %v458_v0, %v1011_v11  ;;  %v1229_v6 = vmul.f32 %v458_v0, %v1035_v17  ;;  %v483_v39 = vrot.slane %v462_v52, 4 }
  0xaa   :  { %v471_v3 = vmul.f32 %v459_v29, %v1016_v12  ;;  %v1233_v7 = vmul.f32 %v459_v29, %v1040_v18  ;;  %v478_v44 = vadd.f32 %v477_v56, %v461_v51  ;;  %v489_v35 = vrot.slane %v463_v54, 4 }
  0xab   :  { %v472_v8 = vmul.f32 %v460_v34, %v1021_v13  ;;  %v1237_v16 = vmul.f32 %v460_v34, %v1049_v21  ;;  %v484_v57 = vadd.f32 %v483_v39, %v462_v52  ;;  %v495_v45 = vrot.slane %v464_v4, 4 }
  0xac   :  { %v479_v38 = vrot.slane %v478_v44, 2  ;;  %v490_v11 = vadd.f32 %v489_v35, %v463_v54  ;;  %v501_v42 = vrot.slane %v465_v25, 4  ;;  %v507_v17 = vrot.slane %v466_v14, 4 }
  0xad   :  { %v485_v15 = vrot.slane %v484_v57, 2  ;;  %v496_v59 = vadd.f32 %v495_v45, %v464_v4  ;;  %v513_v61 = vrot.slane %v467_v40, 4  ;;  %v519_v12 = vrot.slane %v468_v33, 4 }
  0xae   :  { %v480_v20 = vadd.f32 %v479_v38, %v478_v44  ;;  %v491_v18 = vrot.slane %v490_v11, 2  ;;  %v502_v37 = vadd.f32 %v501_v42, %v465_v25  ;;  %v508_v9 = vadd.f32 %v507_v17, %v466_v14 }
  0xaf   :  { %v486_v10 = vadd.f32 %v485_v15, %v484_v57  ;;  %v497_v23 = vrot.slane %v496_v59, 2  ;;  %v514_v13 = vadd.f32 %v513_v61, %v467_v40  ;;  %v520_v58 = vadd.f32 %v519_v12, %v468_v33 }
  0xb0   :  { %v481_v21 = vrot.slane %v480_v20, 1  ;;  %v492_v19 = vadd.f32 %v491_v18, %v490_v11  ;;  %v503_v30 = vrot.slane %v502_v37, 2  ;;  %v509_v48 = vrot.slane %v508_v9, 2 }
  0xb1   :  { %v487_v27 = vrot.slane %v486_v10, 1  ;;  %v498_v28 = vadd.f32 %v497_v23, %v496_v59  ;;  %v515_v32 = vrot.slane %v514_v13, 2  ;;  %v521_v31 = vrot.slane %v520_v58, 2 }
  0xb2   :  { %v482_v41 = vadd.f32 %v481_v21, %v480_v20  ;;  %v493_v22 = vrot.slane %v492_v19, 1  ;;  %v504_v43 = vadd.f32 %v503_v30, %v502_v37  ;;  %v510_v49 = vadd.f32 %v509_v48, %v508_v9 }
  0xb3   :  { %v488_v51 = vadd.f32 %v487_v27, %v486_v10  ;;  %v499_v60 = vrot.slane %v498_v28, 1  ;;  %v516_v25 = vadd.f32 %v515_v32, %v514_v13  ;;  %v522_v26 = vadd.f32 %v521_v31, %v520_v58 }
  0xb4   :  { %v494_v50 = vadd.f32 %v493_v22, %v492_v19  ;;  %v505_v52 = vrot.slane %v504_v43, 1  ;;  %v511_v14 = vrot.slane %v510_v49, 1  ;;  %v525_v63 = vrot.slane %v469_v1, 4 }
  0xb5   :  { %v500_v53 = vadd.f32 %v499_v60, %v498_v28  ;;  %v517_v36 = vrot.slane %v516_v25, 1  ;;  %v523_v54 = vrot.slane %v522_v26, 1  ;;  %v531_v40 = vrot.slane %v470_v2, 4 }
  0xb6   :  { %v506_v55 = vadd.f32 %v505_v52, %v504_v43  ;;  %v512_v0 = vadd.f32 %v511_v14, %v510_v49  ;;  %v526_v4 = vadd.f32 %v525_v63, %v469_v1  ;;  %v537_v33 = vrot.slane %v471_v3, 4 }
  0xb7   :  { %v518_v29 = vadd.f32 %v517_v36, %v516_v25  ;;  %v524_v56 = vadd.f32 %v523_v54, %v522_v26  ;;  %v532_v34 = vadd.f32 %v531_v40, %v470_v2  ;;  %v543_v39 = vrot.slane %v472_v8, 4 }
  0xb8   :  { %v527_v44 = vrot.slane %v526_v4, 2  ;;  %v538_v35 = vadd.f32 %v537_v33, %v471_v3  ;;  %v549_v57 = vrot.slane %v1224_v5, 4  ;;  %v555_v45 = vrot.slane %v1229_v6, 4 }
  0xb9   :  { %v533_v38 = vrot.slane %v532_v34, 2  ;;  %v544_v11 = vadd.f32 %v543_v39, %v472_v8  ;;  %v561_v42 = vrot.slane %v1233_v7, 4  ;;  %v567_v17 = vrot.slane %v1237_v16, 4 }
  0xba   :  { %v528_v15 = vadd.f32 %v527_v44, %v526_v4  ;;  %v539_v59 = vrot.slane %v538_v35, 2  ;;  %v550_v1 = vadd.f32 %v549_v57, %v1224_v5  ;;  %v556_v61 = vadd.f32 %v555_v45, %v1229_v6 }
  0xbb   :  { %v534_v2 = vadd.f32 %v533_v38, %v532_v34  ;;  %v545_v12 = vrot.slane %v544_v11, 2  ;;  %v562_v3 = vadd.f32 %v561_v42, %v1233_v7  ;;  %v568_v20 = vadd.f32 %v567_v17, %v1237_v16 }
  0xbc   :  { %v529_v18 = vrot.slane %v528_v15, 1  ;;  %v540_v37 = vadd.f32 %v539_v59, %v538_v35  ;;  %v551_v9 = vrot.slane %v550_v1, 2  ;;  %v557_v8 = vrot.slane %v556_v61, 2 }
  0xbd   :  { %v535_v10 = vrot.slane %v534_v2, 1  ;;  %v546_v23 = vadd.f32 %v545_v12, %v544_v11  ;;  %v563_v13 = vrot.slane %v562_v3, 2  ;;  %v569_v58 = vrot.slane %v568_v20, 2 }
  0xbe   :  { %v530_v21 = vadd.f32 %v529_v18, %v528_v15  ;;  %v541_v19 = vrot.slane %v540_v37, 1  ;;  %v552_v30 = vadd.f32 %v551_v9, %v550_v1  ;;  %v558_v5 = vadd.f32 %v557_v8, %v556_v61  ;;  %v1379_v15 = vld [vmem:[#allocation4_spill] sm:$0xff] }
  0xbf   :  { %v536_v48 = vadd.f32 %v535_v10, %v534_v2  ;;  %v547_v6 = vrot.slane %v546_v23, 1  ;;  %v564_v27 = vadd.f32 %v563_v13, %v562_v3  ;;  %v570_v28 = vadd.f32 %v569_v58, %v568_v20 }
  0xc0   :  { %v542_v32 = vadd.f32 %v541_v19, %v540_v37  ;;  %v553_v7 = vrot.slane %v552_v30, 1  ;;  %v559_v31 = vrot.slane %v558_v5, 1  ;;  %v573_v16 = vadd.f32 %v530_v21, %v482_v41 }
  0xc1   :  { %v548_v22 = vadd.f32 %v547_v6, %v546_v23  ;;  %v565_v43 = vrot.slane %v564_v27, 1  ;;  %v571_v49 = vrot.slane %v570_v28, 1  ;;  %v574_v60 = vadd.f32 %v536_v48, %v488_v51 }
  0xc2   :  { %v554_v25 = vadd.f32 %v553_v7, %v552_v30  ;;  %v560_v26 = vadd.f32 %v559_v31, %v558_v5  ;;  %v575_v52 = vadd.f32 %v542_v32, %v494_v50  ;;  %v581_v14 = vmul.f32 0.5, %v573_v16 }
  0xc3   :  { %v566_v63 = vadd.f32 %v565_v43, %v564_v27  ;;  %v572_v36 = vadd.f32 %v571_v49, %v570_v28  ;;  %v576_v54 = vadd.f32 %v548_v22, %v500_v53  ;;  %v582_v40 = vmul.f32 0.5, %v574_v60  ;;  %v1377_v53 = vld [vmem:[#allocation2_spill] sm:$0xff] }
  0xc4   :  { %v577_v4 = vadd.f32 %v554_v25, %v506_v55  ;;  %v578_v33 = vadd.f32 %v560_v26, %v512_v0  ;;  %v583_v34 = vmul.f32 0.5, %v575_v52  ;;  %v589_v45 = vadd.f32 %v581_v14, %v1127_v46  ;;  %v1378_v55 = vld [vmem:[#allocation3_spill] sm:$0xff] }
  0xc5   :  { %v579_v39 = vadd.f32 %v566_v63, %v518_v29  ;;  %v580_v44 = vadd.f32 %v572_v36, %v524_v56  ;;  %v584_v35 = vmul.f32 0.5, %v576_v54  ;;  %v590_v51 = vadd.f32 %v582_v40, %v1129_v47  ;;  %v1380_v56 = vld [vmem:[#allocation5_spill] sm:$0xff] }
  0xc6   :  { %v585_v57 = vmul.f32 0.5, %v577_v4  ;;  %v586_v41 = vmul.f32 0.5, %v578_v33  ;;  %v591_v50 = vadd.f32 %v583_v34, %v1131_v24  ;;  %v933_v4 = vld [vmem:[%s1367_s0] sm:$0xff] }
  0xc7   :  { %v587_v38 = vmul.f32 0.5, %v579_v39  ;;  %v588_v11 = vmul.f32 0.5, %v580_v44  ;;  %v592_v42 = vadd.f32 %v584_v35, %v1133_v62  ;;  %v934_v34 = vld [vmem:[%s1367_s0 + $0x20] sm:$0xff] }
  0xc8   :  { %v593_v17 = vadd.f32 %v585_v57, %v1377_v53  ;;  %v594_v0 = vadd.f32 %v586_v41, %v1378_v55  ;;  %v935_v57 = vld [vmem:[%s1367_s0 + $0x8] sm:$0xff]  ;;  %v939_v53 = vld [vmem:[%s1367_s0 + $0x40] sm:$0xff] }
  0xc9   :  { %v595_v29 = vadd.f32 %v587_v38, %v1379_v15  ;;  %v596_v59 = vadd.f32 %v588_v11, %v1380_v56  ;;  %v937_v38 = vld [vmem:[%s1367_s0 + $0x10] sm:$0xff]  ;;  %v940_v55 = vld [vmem:[%s1367_s0 + $0x48] sm:$0xff]  ;;  %v941_v15 = vld [vmem:[%s1367_s0 + $0x18] sm:$0xff] }
  0xca   :  { %v597_v1 = vmax.f32 %v589_v45, %v593_v17  ;;  %v598_v61 = vmax.f32 %v590_v51, %v594_v0  ;;  %v942_v56 = vld [vmem:[%s1367_s0 + $0x38] sm:$0xff] }
  0xcb   :  { %v599_v2 = vmax.f32 %v591_v50, %v595_v29  ;;  %v600_v46 = vmax.f32 %v592_v42, %v596_v59 }
  0xcc   :  { %v601_v12 = vsub.f32 %v589_v45, %v597_v1  ;;  %v602_v47 = vsub.f32 %v590_v51, %v598_v61  ;;  %v605_v3 = vsub.f32 %v593_v17, %v597_v1  ;;  %v606_v24 = vsub.f32 %v594_v0, %v598_v61  ;;  %v936_v45 = vld [vmem:[%s1367_s0 + $0x28] sm:$0xff]  ;;  %v943_v1 = vld [vmem:[%s1367_s0 + $0x50] sm:$0xff] }
  0xcd   :  { %v603_v20 = vsub.f32 %v591_v50, %v599_v2  ;;  %v604_v18 = vsub.f32 %v592_v42, %v600_v46  ;;  %v607_v37 = vsub.f32 %v595_v29, %v599_v2  ;;  %v608_v8 = vsub.f32 %v596_v59, %v600_v46  ;;  %v938_v50 = vld [vmem:[%s1367_s0 + $0x30] sm:$0xff]  ;;  %v944_v2 = vld [vmem:[%s1367_s0 + $0x58] sm:$0xff] }
  0xce   :  { %v609_v62 = vmul.f32 1.442695, %v601_v12  ;;  %v611_v9 = vmul.f32 1.442695, %v602_v47  ;;  %v617_v13 = vmul.f32 1.442695, %v605_v3 }
  0xcf   :  { %v613_v10 = vmul.f32 1.442695, %v603_v20  ;;  %v615_v23 = vmul.f32 1.442695, %v604_v18  ;;  %v619_v58 = vmul.f32 1.442695, %v606_v24 }
  0xd0   :  { %877 = vpow2.f32 %v609_v62  ;;  %v621_v21 = vmul.f32 1.442695, %v607_v37  ;;  %v623_v19 = vmul.f32 1.442695, %v608_v8  ;;  %v945_v12 = vld [vmem:[%s1367_s0 + $0x60] sm:$0xff]  ;;  %v946_v3 = vld [vmem:[%s1367_s0 + $0x68] sm:$0xff] }
  0xd1   :  { %879 = vpow2.f32 %v611_v9  ;;  %v947_v18 = vld [vmem:[%s1367_s0 + $0x70] sm:$0xff]  ;;  %v948_v37 = vld [vmem:[%s1367_s0 + $0x78] sm:$0xff] }
  0xd2   :  { %881 = vpow2.f32 %v613_v10 }
  0xd3   :  { %883 = vpow2.f32 %v615_v23 }
  0xd4   :  { %885 = vpow2.f32 %v617_v13 }
  0xd5   :  { %887 = vpow2.f32 %v619_v58 }
  0xd6   :  { %889 = vpow2.f32 %v621_v21 }
  0xd7   :  { %891 = vpow2.f32 %v623_v19 }
  0xda   :  { %v878_v30 = vpop.eup %877 }
  0xdb   :  { %v880_v5 = vpop.eup %879 }
  0xdc   :  { %v882_v48 = vpop.eup %881 }
  0xdd   :  { %v884_v6 = vpop.eup %883 }
  0xde   :  { %v886_v27 = vpop.eup %885 }
  0xdf   :  { %v888_v28 = vpop.eup %887  ;;  %v625_v32 = vadd.f32 %v886_v27, %v878_v30 }
  0xe0   :  { %v890_v7 = vpop.eup %889  ;;  %v626_v31 = vadd.f32 %v888_v28, %v880_v5 }
  0xe1   :  { %v892_v16 = vpop.eup %891  ;;  %v627_v22 = vadd.f32 %v890_v7, %v882_v48  ;;  %893 = vrcp.f32 %v625_v32 }
  0xe2   :  { %v628_v43 = vadd.f32 %v892_v16, %v884_v6  ;;  %895 = vrcp.f32 %v626_v31 }
  0xe3   :  { %897 = vrcp.f32 %v627_v22 }
  0xe4   :  { %899 = vrcp.f32 %v628_v43 }
  0xeb   :  { %v894_v49 = vpop.eup %893 }
  0xec   :  { %v896_v60 = vpop.eup %895  ;;  %v633_v25 = vmul.f32 %v894_v49, %v878_v30  ;;  %v637_v26 = vmul.f32 %v894_v49, %v886_v27 }
  0xed   :  { %v898_v52 = vpop.eup %897  ;;  %v634_v14 = vmul.f32 %v896_v60, %v880_v5  ;;  %v638_v63 = vmul.f32 %v896_v60, %v888_v28 }
  0xee   :  { %v900_v36 = vpop.eup %899  ;;  %v635_v54 = vmul.f32 %v898_v52, %v882_v48  ;;  %v639_v40 = vmul.f32 %v898_v52, %v890_v7  ;;  %v641_v33 = vmul.f32 %v933_v4, %v633_v25  ;;  %v645_v39 = vmul.f32 %v934_v34, %v637_v26 }
  0xef   :  { %v636_v44 = vmul.f32 %v900_v36, %v884_v6  ;;  %v640_v35 = vmul.f32 %v900_v36, %v892_v16  ;;  %v642_v41 = vmul.f32 %v935_v57, %v634_v14  ;;  %v646_v51 = vmul.f32 %v936_v45, %v638_v63 }
  0xf0   :  { %v643_v11 = vmul.f32 %v937_v38, %v635_v54  ;;  %v647_v42 = vmul.f32 %v938_v50, %v639_v40  ;;  %v649_v17 = vmul.f32 %v939_v53, %v633_v25  ;;  %v650_v0 = vmul.f32 %v940_v55, %v634_v14 }
  0xf1   :  { %v644_v29 = vmul.f32 %v941_v15, %v636_v44  ;;  %v648_v59 = vmul.f32 %v942_v56, %v640_v35  ;;  %v651_v61 = vmul.f32 %v943_v1, %v635_v54  ;;  %v652_v46 = vmul.f32 %v944_v2, %v636_v44 }
  0xf2   :  { %v653_v47 = vmul.f32 %v945_v12, %v637_v26  ;;  %v654_v20 = vmul.f32 %v946_v3, %v638_v63  ;;  %v655_v24 = vmul.f32 %v947_v18, %v639_v40  ;;  %v656_v62 = vmul.f32 %v948_v37, %v640_v35 }
  0xf3   :  { %v1303_v9 = vadd.f32 %v645_v39, %v641_v33  ;;  %v1305_v8 = vadd.f32 %v646_v51, %v642_v41  ;;  %v1307_v10 = vadd.f32 %v647_v42, %v643_v11  ;;  %v1309_v23 = vadd.f32 %v648_v59, %v644_v29 }
  0xf4   :  { %v1311_v13 = vadd.f32 %v653_v47, %v649_v17  ;;  %v1313_v58 = vadd.f32 %v654_v20, %v650_v0  ;;  %v1315_v21 = vadd.f32 %v655_v24, %v651_v61  ;;  %v1317_v19 = vadd.f32 %v656_v62, %v652_v46 }
  0xf5   :  { %v665_v30 = vmul.f32 %v1303_v9, %v1303_v9  ;;  %v666_v5 = vmul.f32 %v1305_v8, %v1305_v8  ;;  %v667_v48 = vmul.f32 %v1307_v10, %v1307_v10  ;;  %v668_v6 = vmul.f32 %v1309_v23, %v1309_v23 }
  0xf6   :  { %v669_v27 = vmul.f32 %v1311_v13, %v1311_v13  ;;  %v670_v28 = vmul.f32 %v1313_v58, %v1313_v58  ;;  %v671_v32 = vmul.f32 %v1315_v21, %v1315_v21  ;;  %v672_v7 = vmul.f32 %v1317_v19, %v1317_v19 }
  0xf7   :  { %v673_v31 = vrot.slane %v665_v30, 4  ;;  %v679_v16 = vrot.slane %v666_v5, 4  ;;  %v685_v22 = vrot.slane %v667_v48, 4  ;;  %v691_v43 = vrot.slane %v668_v6, 4 }
  0xf8   :  { %v697_v49 = vrot.slane %v669_v27, 4  ;;  %v703_v60 = vrot.slane %v670_v28, 4  ;;  %v709_v25 = vrot.slane %v671_v32, 4  ;;  %v715_v26 = vrot.slane %v672_v7, 4 }
  0xf9   :  { %v674_v52 = vadd.f32 %v673_v31, %v665_v30  ;;  %v680_v14 = vadd.f32 %v679_v16, %v666_v5  ;;  %v686_v63 = vadd.f32 %v685_v22, %v667_v48  ;;  %v692_v36 = vadd.f32 %v691_v43, %v668_v6 }
  0xfa   :  { %v698_v54 = vadd.f32 %v697_v49, %v669_v27  ;;  %v704_v40 = vadd.f32 %v703_v60, %v670_v28  ;;  %v710_v4 = vadd.f32 %v709_v25, %v671_v32  ;;  %v716_v33 = vadd.f32 %v715_v26, %v672_v7 }
  0xfb   :  { %v675_v34 = vrot.slane %v674_v52, 2  ;;  %v681_v39 = vrot.slane %v680_v14, 2  ;;  %v687_v44 = vrot.slane %v686_v63, 2  ;;  %v693_v35 = vrot.slane %v692_v36, 2 }
  0xfc   :  { %v699_v57 = vrot.slane %v698_v54, 2  ;;  %v705_v41 = vrot.slane %v704_v40, 2  ;;  %v711_v45 = vrot.slane %v710_v4, 2  ;;  %v717_v51 = vrot.slane %v716_v33, 2 }
  0xfd   :  { %v676_v38 = vadd.f32 %v675_v34, %v674_v52  ;;  %v682_v11 = vadd.f32 %v681_v39, %v680_v14  ;;  %v688_v50 = vadd.f32 %v687_v44, %v686_v63  ;;  %v694_v42 = vadd.f32 %v693_v35, %v692_v36 }
  0xfe   :  { %v700_v53 = vadd.f32 %v699_v57, %v698_v54  ;;  %v706_v17 = vadd.f32 %v705_v41, %v704_v40  ;;  %v712_v55 = vadd.f32 %v711_v45, %v710_v4  ;;  %v718_v0 = vadd.f32 %v717_v51, %v716_v33 }
  0xff   :  { %v677_v15 = vrot.slane %v676_v38, 1  ;;  %v683_v29 = vrot.slane %v682_v11, 1  ;;  %v689_v56 = vrot.slane %v688_v50, 1  ;;  %v695_v59 = vrot.slane %v694_v42, 1 }
 0x100   :  { %v701_v1 = vrot.slane %v700_v53, 1  ;;  %v707_v61 = vrot.slane %v706_v17, 1  ;;  %v713_v2 = vrot.slane %v712_v55, 1  ;;  %v719_v46 = vrot.slane %v718_v0, 1 }
 0x101   :  { %v678_v12 = vadd.f32 %v677_v15, %v676_v38  ;;  %v684_v47 = vadd.f32 %v683_v29, %v682_v11  ;;  %v690_v3 = vadd.f32 %v689_v56, %v688_v50  ;;  %v696_v20 = vadd.f32 %v695_v59, %v694_v42 }
 0x102   :  { %v702_v18 = vadd.f32 %v701_v1, %v700_v53  ;;  %v708_v24 = vadd.f32 %v707_v61, %v706_v17  ;;  %v714_v37 = vadd.f32 %v713_v2, %v712_v55  ;;  %v720_v48 = vadd.f32 %v719_v46, %v718_v0 }
 0x103   :  { %v721_v62 = vadd.f32 1e-09, %v678_v12  ;;  %v722_v30 = vadd.f32 1e-09, %v684_v47  ;;  %v723_v5 = vadd.f32 1e-09, %v690_v3 }
 0x104   :  { %v724_v6 = vadd.f32 1e-09, %v696_v20  ;;  %v725_v27 = vadd.f32 1e-09, %v702_v18  ;;  %v726_v28 = vadd.f32 1e-09, %v708_v24 }
 0x105   :  { %901 = vrsqrt.f32 %v721_v62  ;;  %v727_v32 = vadd.f32 1e-09, %v714_v37  ;;  %v728_v7 = vadd.f32 1e-09, %v720_v48  ;;  %v745_v31 = vadd.f32 1.0, %v678_v12 }
 0x106   :  { %903 = vrsqrt.f32 %v722_v30  ;;  %v746_v16 = vadd.f32 1.0, %v684_v47  ;;  %v747_v22 = vadd.f32 1.0, %v690_v3  ;;  %v748_v43 = vadd.f32 1.0, %v696_v20 }
 0x107   :  { %905 = vrsqrt.f32 %v723_v5  ;;  %v749_v49 = vadd.f32 1.0, %v702_v18  ;;  %v750_v60 = vadd.f32 1.0, %v708_v24  ;;  %v751_v26 = vadd.f32 1.0, %v714_v37 }
 0x108   :  { %907 = vrsqrt.f32 %v724_v6  ;;  %v752_v14 = vadd.f32 1.0, %v720_v48 }
 0x109   :  { %909 = vrsqrt.f32 %v725_v27 }
 0x10a   :  { %911 = vrsqrt.f32 %v726_v28 }
 0x10b   :  { %913 = vrsqrt.f32 %v727_v32 }
 0x10c   :  { %915 = vrsqrt.f32 %v728_v7 }
 0x10d   :  { %917 = vrcp.f32 %v745_v31 }
 0x10e   :  { %919 = vrcp.f32 %v746_v16 }
 0x10f   :  { %v902_v25 = vpop.eup %901  ;;  %921 = vrcp.f32 %v747_v22 }
 0x110   :  { %v904_v52 = vpop.eup %903  ;;  %923 = vrcp.f32 %v748_v43  ;;  %v737_v4 = vmul.f32 %v902_v25, %v678_v12 }
 0x111   :  { %v906_v63 = vpop.eup %905  ;;  %925 = vrcp.f32 %v749_v49  ;;  %v738_v34 = vmul.f32 %v904_v52, %v684_v47 }
 0x112   :  { %v908_v36 = vpop.eup %907  ;;  %927 = vrcp.f32 %v750_v60  ;;  %v739_v44 = vmul.f32 %v906_v63, %v690_v3 }
 0x113   :  { %v910_v54 = vpop.eup %909  ;;  %929 = vrcp.f32 %v751_v26  ;;  %v740_v57 = vmul.f32 %v908_v36, %v696_v20 }
 0x114   :  { %v912_v40 = vpop.eup %911  ;;  %931 = vrcp.f32 %v752_v14  ;;  %v741_v45 = vmul.f32 %v910_v54, %v702_v18 }
 0x115   :  { %v914_v33 = vpop.eup %913  ;;  %v742_v11 = vmul.f32 %v912_v40, %v708_v24 }
 0x116   :  { %v916_v39 = vpop.eup %915  ;;  %v743_v53 = vmul.f32 %v914_v33, %v714_v37 }
 0x117   :  { %v918_v35 = vpop.eup %917  ;;  %v744_v15 = vmul.f32 %v916_v39, %v720_v48 }
 0x118   :  { %v920_v41 = vpop.eup %919  ;;  %v761_v51 = vmul.f32 %v918_v35, %v737_v4 }
 0x119   :  { %v922_v38 = vpop.eup %921  ;;  %v762_v50 = vmul.f32 %v920_v41, %v738_v34 }
 0x11a   :  { %v924_v42 = vpop.eup %923  ;;  %v763_v17 = vmul.f32 %v922_v38, %v739_v44  ;;  %v769_v55 = vmul.f32 %v761_v51, %v1303_v9 }
 0x11b   :  { %v926_v0 = vpop.eup %925  ;;  %v764_v29 = vmul.f32 %v924_v42, %v740_v57  ;;  %v770_v56 = vmul.f32 %v762_v50, %v1305_v8 }
 0x11c   :  { %v928_v59 = vpop.eup %927  ;;  %v765_v1 = vmul.f32 %v926_v0, %v741_v45  ;;  %v771_v61 = vmul.f32 %v763_v17, %v1307_v10  ;;  %777 = vst [vmem:[%s1368_s1] sm:$0xff] %v769_v55 }
 0x11d   :  { %v930_v2 = vpop.eup %929  ;;  %v766_v46 = vmul.f32 %v928_v59, %v742_v11  ;;  %v772_v12 = vmul.f32 %v764_v29, %v1309_v23  ;;  %778 = vst [vmem:[%s1368_s1 + $0x8] sm:$0xff] %v770_v56 }
 0x11e   :  { %v932_v9 = vpop.eup %931  ;;  %v767_v47 = vmul.f32 %v930_v2, %v743_v53  ;;  %v773_v8 = vmul.f32 %v765_v1, %v1311_v13  ;;  %779 = vst [vmem:[%s1368_s1 + $0x10] sm:$0xff] %v771_v61 }
 0x11f   :  { %v768_v10 = vmul.f32 %v932_v9, %v744_v15  ;;  %v774_v3 = vmul.f32 %v766_v46, %v1313_v58  ;;  %780 = vst [vmem:[%s1368_s1 + $0x18] sm:$0xff] %v772_v12 }
 0x120   :  { %v775_v23 = vmul.f32 %v767_v47, %v1315_v21  ;;  %781 = vst [vmem:[%s1368_s1 + $0x20] sm:$0xff] %v773_v8 }
 0x121   :  { %v776_v20 = vmul.f32 %v768_v10, %v1317_v19  ;;  %782 = vst [vmem:[%s1368_s1 + $0x28] sm:$0xff] %v774_v3 }
 0x122   :  { %783 = vst [vmem:[%s1368_s1 + $0x30] sm:$0xff] %v775_v23 }
 0x123   :  { %784 = vst [vmem:[%s1368_s1 + $0x38] sm:$0xff] %v776_v20 }

</bundles_post_ra>
